<compile_context>
chip_gen: v7x
topology: tpu7x:2x2x1
jax: 0.10.0
libtpu: 0.0.40
codegen_flags: <defaults>
</compile_context>

<pallas_src>
import functools

import jax
import jax.numpy as jnp
from jax.experimental import pallas as pl
from jax.experimental.pallas import tpu as pltpu

_LANES = 128
_MAX_BLOCK_ROWS = 2048  # (2048, 128) f32 = 1 MiB per input block


def _dist_angles_kernel(p_ref, t_ref, o_ref, *, cycle, half_cycle,
                        valid_rows, block_rows):
    """One grid step: angle distance on a (block_rows, 128) tile, reduced to an
    (8, 128) partial-sum tile written to this step's own output block."""
    i = pl.program_id(0)

    # In-kernel upcast (VPU work hidden under the DMA); HBM traffic stays native.
    p = p_ref[...].astype(jnp.float32)
    t = t_ref[...].astype(jnp.float32)

    # torch.fmod semantics (result carries the sign of the dividend):
    #   fmod(x, c) = x - trunc(x / c) * c     (cycle is a compile-time constant)
    p = p - jnp.trunc(p / cycle) * cycle
    t = t - jnp.trunc(t / cycle) * cycle

    d = half_cycle - jnp.abs(jnp.abs(p - t) - half_cycle)

    # Mask rows beyond the array (ragged last block reads undefined data).
    # Mask d (not p/t) so NaN/Inf garbage cannot leak into the sum.
    row_ids = i * block_rows + jax.lax.broadcasted_iota(jnp.int32, d.shape, 0)
    d = jnp.where(row_ids < valid_rows, d, 0.0)

    # Fold the block down to one (8, 128) vreg of partial sums: pure VPU adds;
    # the single cross-lane reduce happens once, in the wrapper.
    o_ref[...] = jnp.sum(d.reshape(block_rows // 8, 8, _LANES), axis=0)


def distance_between_angles(predict: jax.Array, target: jax.Array,
                            cycle: float = 1.0, *,
                            max_block_rows: int = _MAX_BLOCK_ROWS) -> jax.Array:
    """Pallas implementation of DistanceBetweenAngles.forward (returns f32 scalar)."""
    assert predict.shape == target.shape, "predict/target must have the same shape"
    n_true = predict.size
    if n_true == 0:
        return jnp.float32(jnp.nan)

    # Flatten; keep native dtype (no extra HBM bytes for sub-32-bit inputs).
    p_flat = predict.reshape(-1)
    t_flat = target.reshape(-1)

    # Lane-align only if the element count is not a multiple of 128 (no-op for
    # typical shapes). Zero padding is exact: fmod(0) = 0 -> d = 0 contribution,
    # and we divide by the true element count.
    pad = (-n_true) % _LANES
    if pad:
        # TODO(synk): a 1-D block layout could avoid this copy for ragged sizes.
        p_flat = jnp.pad(p_flat, (0, pad))
        t_flat = jnp.pad(t_flat, (0, pad))

    rows = p_flat.size // _LANES
    p2d = p_flat.reshape(rows, _LANES)
    t2d = t_flat.reshape(rows, _LANES)

    # Sublane multiple: 8 for 4-byte dtypes, 16 for bf16, 32 for 1-byte dtypes.
    sub = max(8, 32 // jnp.dtype(predict.dtype).itemsize)
    block_rows = min(int(max_block_rows), ((rows + sub - 1) // sub) * sub)
    block_rows = ((block_rows + sub - 1) // sub) * sub  # keep a multiple of `sub`
    n_blocks = int(pl.cdiv(rows, block_rows))

    kernel = functools.partial(
        _dist_angles_kernel,
        cycle=float(cycle),             # plain Python scalars: baked into the
        half_cycle=float(cycle) / 2.0,  # kernel, not captured traced constants.
        valid_rows=int(rows),
        block_rows=int(block_rows),
    )

    partials = pl.pallas_call(
        kernel,
        out_shape=jax.ShapeDtypeStruct((8, n_blocks * _LANES), jnp.float32),
        grid_spec=pltpu.PrefetchScalarGridSpec(
            num_scalar_prefetch=0,
            grid=(n_blocks,),
            in_specs=[
                pl.BlockSpec((block_rows, _LANES), lambda i: (i, 0)),
                pl.BlockSpec((block_rows, _LANES), lambda i: (i, 0)),
            ],
            # Each grid step owns its own lane-dense (8, 128) output tile.
            out_specs=pl.BlockSpec((8, _LANES), lambda i: (0, i)),
        ),
        compiler_params=pltpu.CompilerParams(
            dimension_semantics=("parallel",),   # independent steps -> both TCs on v7x
        ),
    )(p2d, t2d)

    # Tiny final reduction + mean in the wrapper.
    return jnp.sum(partials) / jnp.float32(n_true)


def _reference(predict, target, cycle=1.0):
    half = cycle / 2.0
    p = jnp.fmod(predict.astype(jnp.float32), cycle)
    t = jnp.fmod(target.astype(jnp.float32), cycle)
    return jnp.mean(half - jnp.abs(jnp.abs(p - t) - half))


if __name__ == "__main__":
    key = jax.random.PRNGKey(0)
    k1, k2, k3, k4 = jax.random.split(key, 4)

    # Case 1: typical NCHW angle map (2*4*16*16 = 2048 elems, lane-aligned -> no pad).
    shape = (2, 4, 16, 16)
    predict = jax.random.uniform(k1, shape, jnp.float32, minval=-3.0, maxval=3.0)
    target = jax.random.uniform(k2, shape, jnp.float32, minval=-3.0, maxval=3.0)
    loss = jax.block_until_ready(distance_between_angles(predict, target, cycle=1.0))
    ref = _reference(predict, target, cycle=1.0)
    assert jnp.allclose(loss, ref, atol=1e-5, rtol=1e-5), (loss, ref)

    # Case 2: ragged element count + forced multi-block grid to exercise the
    # in-kernel tail-masking path.
    shape2 = (2, 9, 130)  # 2340 elems -> 19 rows of 128
    p2 = jax.random.uniform(k3, shape2, jnp.float32, minval=-3.0, maxval=3.0)
    t2 = jax.random.uniform(k4, shape2, jnp.float32, minval=-3.0, maxval=3.0)
    loss2 = jax.block_until_ready(
        distance_between_angles(p2, t2, cycle=1.0, max_block_rows=8))
    ref2 = _reference(p2, t2, cycle=1.0)
    assert jnp.allclose(loss2, ref2, atol=1e-5, rtol=1e-5), (loss2, ref2)

    print("KERNEL_OK")
</pallas_src>

<mosaic_0001>
module attributes {stable_mosaic.version = 11 : i64} {
  func.func @_dist_angles_kernel(%arg0: i32, %arg1: memref<16x128xf32, #tpu.memory_space<vmem>>, %arg2: memref<16x128xf32, #tpu.memory_space<vmem>>, %arg3: memref<8x128xf32, #tpu.memory_space<vmem>>) attributes {dimension_semantics = [#tpu.dimension_semantics<parallel>], iteration_bounds = array<i64: 1>, scalar_prefetch = 0 : i64, scratch_operands = 0 : i64, tpu.core_type = #tpu.core_type<tc>, window_params = [{transform_indices = @transform_0, window_bounds = array<i64: 16, 128>}, {transform_indices = @transform_1, window_bounds = array<i64: 16, 128>}, {transform_indices = @transform_2, window_bounds = array<i64: 8, 128>}]} {
    %c0 = arith.constant 0 : index
    %c0_0 = arith.constant 0 : index
    %0 = vector.load %arg1[%c0, %c0_0] : memref<16x128xf32, #tpu.memory_space<vmem>>, vector<16x128xf32>
    %c0_1 = arith.constant 0 : index
    %c0_2 = arith.constant 0 : index
    %1 = vector.load %arg2[%c0_1, %c0_2] : memref<16x128xf32, #tpu.memory_space<vmem>>, vector<16x128xf32>
    %cst = arith.constant 1.000000e+00 : f32
    %2 = vector.broadcast %cst : f32 to vector<16x128xf32>
    %3 = arith.divf %0, %2 : vector<16x128xf32>
    %cst_3 = arith.constant 0.000000e+00 : f32
    %4 = vector.broadcast %cst_3 : f32 to vector<16x128xf32>
    %5 = arith.cmpf olt, %3, %4 : vector<16x128xf32>
    %6 = math.ceil %3 : vector<16x128xf32>
    %7 = math.floor %3 : vector<16x128xf32>
    %8 = arith.select %5, %6, %7 : vector<16x128xi1>, vector<16x128xf32>
    %cst_4 = arith.constant 1.000000e+00 : f32
    %9 = vector.broadcast %cst_4 : f32 to vector<16x128xf32>
    %10 = arith.mulf %8, %9 : vector<16x128xf32>
    %11 = arith.subf %0, %10 : vector<16x128xf32>
    %cst_5 = arith.constant 1.000000e+00 : f32
    %12 = vector.broadcast %cst_5 : f32 to vector<16x128xf32>
    %13 = arith.divf %1, %12 : vector<16x128xf32>
    %cst_6 = arith.constant 0.000000e+00 : f32
    %14 = vector.broadcast %cst_6 : f32 to vector<16x128xf32>
    %15 = arith.cmpf olt, %13, %14 : vector<16x128xf32>
    %16 = math.ceil %13 : vector<16x128xf32>
    %17 = math.floor %13 : vector<16x128xf32>
    %18 = arith.select %15, %16, %17 : vector<16x128xi1>, vector<16x128xf32>
    %cst_7 = arith.constant 1.000000e+00 : f32
    %19 = vector.broadcast %cst_7 : f32 to vector<16x128xf32>
    %20 = arith.mulf %18, %19 : vector<16x128xf32>
    %21 = arith.subf %1, %20 : vector<16x128xf32>
    %22 = arith.subf %11, %21 : vector<16x128xf32>
    %23 = math.absf %22 : vector<16x128xf32>
    %cst_8 = arith.constant 5.000000e-01 : f32
    %24 = vector.broadcast %cst_8 : f32 to vector<16x128xf32>
    %25 = arith.subf %23, %24 : vector<16x128xf32>
    %26 = math.absf %25 : vector<16x128xf32>
    %cst_9 = arith.constant 5.000000e-01 : f32
    %27 = vector.broadcast %cst_9 : f32 to vector<16x128xf32>
    %28 = arith.subf %27, %26 : vector<16x128xf32>
    %c16_i32 = arith.constant 16 : i32
    %29 = arith.muli %arg0, %c16_i32 : i32
    %30 = tpu.iota {dimensions = array<i32: 0>} : vector<16x128xi32>
    %31 = vector.broadcast %29 : i32 to vector<16x128xi32>
    %32 = arith.addi %31, %30 : vector<16x128xi32>
    %c16_i32_10 = arith.constant 16 : i32
    %33 = vector.broadcast %c16_i32_10 : i32 to vector<16x128xi32>
    %34 = arith.cmpi slt, %32, %33 : vector<16x128xi32>
    %cst_11 = arith.constant 0.000000e+00 : f32
    %35 = vector.broadcast %cst_11 : f32 to vector<16x128xf32>
    %36 = arith.select %34, %28, %35 : vector<16x128xi1>, vector<16x128xf32>
    %37 = vector.shape_cast %36 : vector<16x128xf32> to vector<2x8x128xf32>
    %cst_12 = arith.constant dense<0.000000e+00> : vector<8x128xf32>
    %38 = vector.multi_reduction <add>, %37, %cst_12 [0] : vector<2x8x128xf32> to vector<8x128xf32>
    %c0_13 = arith.constant 0 : index
    %c0_14 = arith.constant 0 : index
    %39 = vector.load %arg3[%c0_13, %c0_14] : memref<8x128xf32, #tpu.memory_space<vmem>>, vector<8x128xf32>
    tpu.vector_store %arg3[%c0_13, %c0_14], %38 {strides = array<i32>} : memref<8x128xf32, #tpu.memory_space<vmem>>, vector<8x128xf32>,
    return
  }
  func.func @transform_0(%arg0: i32) -> (i32, i32) {
    %c0_i32 = arith.constant 0 : i32
    %c0_i32_0 = arith.constant 0 : i32
    return %arg0, %c0_i32 : i32, i32
  }
  func.func @transform_1(%arg0: i32) -> (i32, i32) {
    %c0_i32 = arith.constant 0 : i32
    %c0_i32_0 = arith.constant 0 : i32
    return %arg0, %c0_i32 : i32, i32
  }
  func.func @transform_2(%arg0: i32) -> (i32, i32) {
    %c0_i32 = arith.constant 0 : i32
    %c0_i32_0 = arith.constant 0 : i32
    return %c0_i32, %arg0 : i32, i32
  }
}

</mosaic_0001>

<bundles_post_ra>
// kernel: tpu_custom_call.1
= control target key start
LH: loop header
LB: loop body
LE: loop exit
PB: predicated region body
PF: predicated region fallthrough
CT: control target
= control target key end

     0   :  { %7 = vsyncpa [#allocation3], 0  ;;  %s238_s0 = inlined_call_operand.hbm [shape: f32[16,128], index: 0, kind: input, shape index: {}]   ;;  %s239_s1 = inlined_call_operand.hbm [shape: f32[16,128], index: 1, kind: input, shape index: {}]   ;;  %s240_s2 = inlined_call_operand.hbm [shape: f32[8,128], index: 2, kind: output, shape index: {}]  }
   0x1   :  { %8 = vsyncpa [#allocation6], 0 }
   0x2   :  { %9 = vsyncpa [#allocation4], 0  ;;  %s182_s9 = smov [#allocation2]   ;;  %s110_s13 = scalar_lea.hbm %s238_s0, 256 }
   0x3   :  { %s15_s10 = sshll.u32 %s182_s9, 4  ;;  %p111_p0 = scmp.ne.s32.totalorder %s238_s0, %s110_s13  ;;  %s16_s10 = int_to_ptr.vmem [resolvable:$true] %s15_s10 }
   0x4   :  { %p114_p1 = scmp.lt.u32.totalorder %s110_s13, %s238_s0 }
   0x6   :  { %p116_p2 = pnand %p114_p1, %p111_p0 }
   0x8   :  { %119 = shalt.err (!%p116_p2)
}
   0x9   :  { %s120_s18 = scalar_lea.vmem %s16_s10, 256  ;;  %p125_p4 = scmp.lt.s32.totalorder %s16_s10, %s16_s10 }
   0xa   :  { %p121_p3 = scmp.ne.s32.totalorder %s16_s10, %s120_s18  ;;  %p126_p5 = scmp.lt.s32.totalorder %s120_s18, %s120_s18 }
   0xc   :  { %p127_p6 = por %p126_p5, %p125_p4 }
   0xe   :  { %p128_p7 = pnand %p127_p6, %p121_p3 }
  0x10   :  { %131 = shalt.err (!%p128_p7)
}
  0x11   :  { %s183_s19 = smov 128   ;;  %s184_s20 = smov 8  }
  0x12   :  { %21 = dma.hbm_to_vmem [thread:$0]  %s238_s0, 256, %s16_s10, [#allocation3], %s183_s19, %s183_s19, %s184_s20  }
  0x13   :  { %s185_s23 = smov [#allocation5]   ;;  %s132_s27 = scalar_lea.hbm %s239_s1, 256 }
  0x14   :  { %s27_s24 = sshll.u32 %s185_s23, 4  ;;  %p133_p8 = scmp.ne.s32.totalorder %s239_s1, %s132_s27  ;;  %s28_s24 = int_to_ptr.vmem [resolvable:$true] %s27_s24 }
  0x15   :  { %p136_p9 = scmp.lt.u32.totalorder %s132_s27, %s239_s1 }
  0x17   :  { %p138_p10 = pnand %p136_p9, %p133_p8 }
  0x19   :  { %141 = shalt.err (!%p138_p10)
}
  0x1a   :  { %s142_s4 = scalar_lea.vmem %s28_s24, 256  ;;  %p147_p12 = scmp.lt.s32.totalorder %s28_s24, %s28_s24 }
  0x1b   :  { %p143_p11 = scmp.ne.s32.totalorder %s28_s24, %s142_s4  ;;  %p148_p13 = scmp.lt.s32.totalorder %s142_s4, %s142_s4 }
  0x1d   :  { %p149_p0 = por %p148_p13, %p147_p12 }
  0x1f   :  { %p150_p1 = pnand %p149_p0, %p143_p11 }
  0x21   :  { %153 = shalt.err (!%p150_p1)
}
  0x22   :  { %33 = dma.hbm_to_vmem [thread:$0]  %s239_s1, 256, %s28_s24, [#allocation6], %s183_s19, %s183_s19, %s184_s20  }
  0x23   :  { %176 = dma.done.wait [#allocation3], 256  }
  0x24   :  { %177 = vsyncadd [#allocation3], 4294967040 }
  0x25   :  { %178 = dma.done.wait [#allocation6], 256  }
  0x26   :  { %179 = vsyncadd [#allocation6], 4294967040  ;;  %v40_v0 = vld [vmem:[#allocation2] sm:$0xff]  ;;  %v41_v1 = vld [vmem:[#allocation2 + $0x8] sm:$0xff]  ;;  %s186_s1 = smov [#allocation7]  }
  0x27   :  { %v42_v2 = vld [vmem:[#allocation5] sm:$0xff]  ;;  %v43_v3 = vld [vmem:[#allocation5 + $0x8] sm:$0xff]  ;;  %vm44_vm0 = vcmp.lt.f32.partialorder %v40_v0, 0.0  ;;  %vm45_vm1 = vcmp.lt.f32.partialorder %v41_v1, 0.0  ;;  %v46_v4 = vceil.f32 %v40_v0  ;;  %v47_v5 = vceil.f32 %v41_v1  ;;  %s93_s6 = sshll.u32 %s186_s1, 4  ;;  %s94_s6 = int_to_ptr.vmem [resolvable:$true] %s93_s6 }
  0x28   :  { %v48_v6 = vfloor.f32 %v40_v0  ;;  %v49_v7 = vfloor.f32 %v41_v1  ;;  %vm54_vm2 = vcmp.lt.f32.partialorder %v42_v2, 0.0  ;;  %vm55_vm3 = vcmp.lt.f32.partialorder %v43_v3, 0.0  ;;  %s154_s7 = scalar_lea.vmem %s94_s6, 128  ;;  %p159_p3 = scmp.lt.s32.totalorder %s94_s6, %s94_s6 }
  0x29   :  { %v56_v8 = vceil.f32 %v42_v2  ;;  %v57_v9 = vceil.f32 %v43_v3  ;;  %v58_v10 = vfloor.f32 %v42_v2  ;;  %v59_v11 = vfloor.f32 %v43_v3  ;;  %p155_p2 = scmp.ne.s32.totalorder %s94_s6, %s154_s7  ;;  %p160_p4 = scmp.lt.s32.totalorder %s154_s7, %s154_s7 }
  0x2a   :  { %v50_v12 = vsel %vm44_vm0, %v46_v4, %v48_v6  ;;  %v51_v13 = vsel %vm45_vm1, %v47_v5, %v49_v7 }
  0x2b   :  { %v52_v14 = vsub.f32 %v40_v0, %v50_v12  ;;  %v53_v15 = vsub.f32 %v41_v1, %v51_v13  ;;  %v60_v16 = vsel %vm54_vm2, %v56_v8, %v58_v10  ;;  %v61_v17 = vsel %vm55_vm3, %v57_v9, %v59_v11  ;;  %p161_p5 = por %p160_p4, %p159_p3 }
  0x2c   :  { %v62_v18 = vsub.f32 %v42_v2, %v60_v16  ;;  %v63_v19 = vsub.f32 %v43_v3, %v61_v17 }
  0x2d   :  { %p162_p6 = pnand %p161_p5, %p155_p2 }
  0x2e   :  { %v64_v20 = vsub.f32 %v52_v14, %v62_v18  ;;  %v65_v21 = vsub.f32 %v53_v15, %v63_v19 }
  0x30   :  { %v66_v22 = vand.u32 2147483647, %v64_v20  ;;  %v67_v23 = vand.u32 2147483647, %v65_v21 }
  0x32   :  { %v103_v24 = vadd.f32 -0.5, %v66_v22  ;;  %v104_v25 = vadd.f32 -0.5, %v67_v23 }
  0x34   :  { %v70_v26 = vand.u32 2147483647, %v103_v24  ;;  %v71_v27 = vand.u32 2147483647, %v104_v25 }
  0x36   :  { %v72_v28 = vsub.f32 0.5, %v70_v26  ;;  %v73_v29 = vsub.f32 0.5, %v71_v27 }
  0x38   :  { %v85_v30 = vadd.f32 %v73_v29, %v72_v28 }
  0x3a   :  { %86 = vst [vmem:[#allocation7] sm:$0xff] %v85_v30 }
  0x3b   :  { %165 = shalt.err (!%p162_p6)
}
  0x3c   :  { %s166_s10 = scalar_lea.hbm %s240_s2, 128 }
  0x3d   :  { %p167_p7 = scmp.ne.s32.totalorder %s240_s2, %s166_s10  ;;  %p170_p8 = scmp.lt.u32.totalorder %s166_s10, %s240_s2 }
  0x3f   :  { %p172_p9 = pnand %p170_p8, %p167_p7 }
  0x41   :  { %175 = shalt.err (!%p172_p9)
}
  0x42   :  { %96 = dma.vmem_to_hbm [thread:$0]  %s94_s6, 128, %s240_s2, [#allocation4]  }
  0x43   :  { %180 = dma.done.wait [#allocation4], 128  }
  0x44   :  { %181 = vsyncadd [#allocation4], 4294967168 }
  0x45   :  { %100 = vsyncpa [#allocation3], 1 }
  0x46   :  { %101 = vsyncpa [#allocation6], 1 }
  0x47   :  { %102 = vsyncpa [#allocation4], 1 }

</bundles_post_ra>
